<compile_context>
chip_gen: v7x
topology: tpu7x:2x2x1
jax: 0.10.0
libtpu: 0.0.40
codegen_flags: <defaults>
</compile_context>

<pallas_src>
import functools

import jax
import jax.numpy as jnp
from jax.experimental import pallas as pl
from jax.experimental.pallas import tpu as pltpu


def _pick_block_b(B, N, C, itemsize):
    """Batch elements per grid step: keep x block small and keep >=2 grid steps."""
    max_by_vmem = max(1, (1 << 20) // max(1, N * C * itemsize))
    bt = max(1, min(4, max_by_vmem, B // 2 if B >= 2 else 1))
    while bt > 1 and B % bt:
        bt -= 1
    return bt


def _attention_kernel(x_ref, wqkv_ref, wproj_ref, bias_ref, o_ref,
                      *, num_heads, head_dim, block_b):
    H, hd = num_heads, head_dim
    wqkv = wqkv_ref[...]        # (3C, C) bf16, softmax scale pre-folded into q rows
    wproj = wproj_ref[...]      # (H, hd, C) bf16  (= W_proj.T reshaped in wrapper)
    bias = bias_ref[...]        # (1, C) f32

    for bi in range(block_b):
        x = x_ref[bi].astype(jnp.bfloat16)                  # (N, C)
        n_tok = x.shape[0]

        # qkv^T = Wqkv @ x^T -> (3C, N). Both operands contract over C, so no
        # explicit transpose op is emitted; one full-width MXU matmul.
        qkv_t = jax.lax.dot_general(
            wqkv, x, (((1,), (1,)), ((), ())),
            preferred_element_type=jnp.float32)             # (3C, N) f32

        # (3C, N) -> (3H, hd, N): splits the major (sublane) axis only (cheap),
        # then one batched minor transpose gives head-major (3H, N, hd).
        qkv_h = jnp.swapaxes(qkv_t.reshape(3 * H, hd, n_tok), 1, 2)  # (3H, N, hd)

        q = qkv_h[:H].astype(jnp.bfloat16)       # (H, N, hd); scale already folded
        k = qkv_h[H:2 * H].astype(jnp.bfloat16)  # (H, N, hd)
        v = qkv_h[2 * H:].astype(jnp.bfloat16)   # (H, N, hd)

        # Head-batched attention core; softmax math kept in f32.
        s = jnp.einsum('hnd,hmd->hnm', q, k,
                       preferred_element_type=jnp.float32)  # (H, N, N)
        s = s - jnp.max(s, axis=-1, keepdims=True)
        p = jnp.exp(s)
        p = p * pl.reciprocal(jnp.sum(p, axis=-1, keepdims=True), approx=True)

        # TODO(synk): attn_drop / proj_drop are identity in eval mode; training dropout not implemented.
        ctx = jnp.einsum('hnm,hmd->hnd', p.astype(jnp.bfloat16), v,
                         preferred_element_type=jnp.float32)          # (H, N, hd)

        # Output projection folded over heads: no lane-axis concat needed.
        out_h = jnp.einsum('hnd,hdc->hnc', ctx.astype(jnp.bfloat16), wproj,
                           preferred_element_type=jnp.float32)        # (H, N, C)
        out = jnp.sum(out_h, axis=0) + bias                           # (N, C) f32
        o_ref[bi] = out.astype(o_ref.dtype)


def attention_pallas(x, w_qkv, w_proj, b_proj, *, num_heads, block_b=None):
    B, N, C = x.shape
    assert C % num_heads == 0
    head_dim = C // num_heads
    scale = head_dim ** (-0.5)

    # Fold softmax scale into the q rows of Wqkv (rows [0, C)); cast weights to bf16.
    w_qkv_f32 = w_qkv.astype(jnp.float32)
    w_qkv_bf16 = jnp.concatenate(
        [w_qkv_f32[:C] * scale, w_qkv_f32[C:]], axis=0).astype(jnp.bfloat16)   # (3C, C)

    # Pre-shape proj weight so the kernel never transposes or concatenates:
    # wproj_h[h, d, c] = W_proj[c, h*hd + d]
    w_proj_h = jnp.transpose(w_proj.astype(jnp.float32)).reshape(
        num_heads, head_dim, C).astype(jnp.bfloat16)                           # (H, hd, C)
    b_proj_2d = b_proj.astype(jnp.float32).reshape(1, C)

    if block_b is None:
        block_b = _pick_block_b(B, N, C, jnp.dtype(x.dtype).itemsize)
    assert B % block_b == 0, "block_b must divide the batch size"

    kernel = functools.partial(_attention_kernel, num_heads=num_heads,
                               head_dim=head_dim, block_b=block_b)

    return pl.pallas_call(
        kernel,
        out_shape=jax.ShapeDtypeStruct((B, N, C), x.dtype),
        grid_spec=pltpu.PrefetchScalarGridSpec(
            num_scalar_prefetch=0,
            grid=(B // block_b,),
            in_specs=[
                pl.BlockSpec((block_b, N, C), lambda b: (b, 0, 0)),            # x
                pl.BlockSpec((3 * C, C), lambda b: (0, 0)),                    # qkv weight (bf16)
                pl.BlockSpec((num_heads, head_dim, C), lambda b: (0, 0, 0)),   # proj weight (bf16)
                pl.BlockSpec((1, C), lambda b: (0, 0)),                        # proj bias (f32)
            ],
            out_specs=pl.BlockSpec((block_b, N, C), lambda b: (b, 0, 0)),
        ),
        compiler_params=pltpu.CompilerParams(
            dimension_semantics=("parallel",),
            vmem_limit_bytes=32 * 1024 * 1024,
        ),
    )(x, w_qkv_bf16, w_proj_h, b_proj_2d)


def attention_reference(x, w_qkv, w_proj, b_proj, *, num_heads):
    """Pure-JAX f32 reference mirroring the PyTorch forward."""
    B, N, C = x.shape
    head_dim = C // num_heads
    scale = head_dim ** (-0.5)
    qkv = x @ w_qkv.T                                  # (B, N, 3C), qkv_bias=False
    qkv = qkv.reshape(B, N, 3, num_heads, head_dim).transpose(2, 0, 3, 1, 4)
    q, k, v = qkv[0], qkv[1], qkv[2]                   # (B, H, N, hd)
    attn = (q @ jnp.swapaxes(k, -2, -1)) * scale       # (B, H, N, N)
    attn = jax.nn.softmax(attn, axis=-1)
    out = (attn @ v).transpose(0, 2, 1, 3).reshape(B, N, C)
    return out @ w_proj.T + b_proj


if __name__ == "__main__":
    # Small shapes consistent with the module: B=2 batches, N=16 tokens, C=64 dim, 4 heads.
    B, N, C = 2, 16, 64
    num_heads = 4

    key = jax.random.PRNGKey(0)
    kx, kqkv, kproj, kb = jax.random.split(key, 4)

    x = jax.random.normal(kx, (B, N, C), dtype=jnp.float32)
    w_qkv = jax.random.normal(kqkv, (3 * C, C), dtype=jnp.float32) * 0.05   # qkv_bias=False
    w_proj = jax.random.normal(kproj, (C, C), dtype=jnp.float32) * 0.05
    b_proj = jax.random.normal(kb, (C,), dtype=jnp.float32) * 0.05

    out = attention_pallas(x, w_qkv, w_proj, b_proj, num_heads=num_heads)
    out = jax.block_until_ready(out)

    ref = attention_reference(x, w_qkv, w_proj, b_proj, num_heads=num_heads)
    assert out.shape == (B, N, C)
    max_err = jnp.max(jnp.abs(out - ref))
    # bf16 matmul operands + approx reciprocal -> bf16-level tolerance.
    assert jnp.allclose(out, ref, atol=2e-2, rtol=2e-2), f"mismatch vs reference (max abs err {max_err})"

    print("KERNEL_OK")
</pallas_src>

<mosaic_0001>
module attributes {stable_mosaic.version = 11 : i64} {
  func.func @_attention_kernel(%arg0: i32, %arg1: memref<1x16x64xf32, #tpu.memory_space<vmem>>, %arg2: memref<192x64xbf16, #tpu.memory_space<vmem>>, %arg3: memref<4x16x64xbf16, #tpu.memory_space<vmem>>, %arg4: memref<1x64xf32, #tpu.memory_space<vmem>>, %arg5: memref<1x16x64xf32, #tpu.memory_space<vmem>>) attributes {dimension_semantics = [#tpu.dimension_semantics<parallel>], iteration_bounds = array<i64: 2>, scalar_prefetch = 0 : i64, scratch_operands = 0 : i64, tpu.core_type = #tpu.core_type<tc>, window_params = [{transform_indices = @transform_0, window_bounds = array<i64: 1, 16, 64>}, {pipeline_mode = #tpu.pipeline_mode<synchronous>, transform_indices = @transform_1, window_bounds = array<i64: 192, 64>}, {pipeline_mode = #tpu.pipeline_mode<synchronous>, transform_indices = @transform_2, window_bounds = array<i64: 4, 16, 64>}, {pipeline_mode = #tpu.pipeline_mode<synchronous>, transform_indices = @transform_3, window_bounds = array<i64: 1, 64>}, {transform_indices = @transform_4, window_bounds = array<i64: 1, 16, 64>}]} {
    %c0 = arith.constant 0 : index
    %c0_0 = arith.constant 0 : index
    %0 = vector.load %arg2[%c0, %c0_0] : memref<192x64xbf16, #tpu.memory_space<vmem>>, vector<192x64xbf16>
    %c0_1 = arith.constant 0 : index
    %c0_2 = arith.constant 0 : index
    %c0_3 = arith.constant 0 : index
    %1 = vector.load %arg3[%c0_1, %c0_2, %c0_3] : memref<4x16x64xbf16, #tpu.memory_space<vmem>>, vector<4x16x64xbf16>
    %c0_4 = arith.constant 0 : index
    %c0_5 = arith.constant 0 : index
    %2 = vector.load %arg4[%c0_4, %c0_5] : memref<1x64xf32, #tpu.memory_space<vmem>>, vector<1x64xf32>
    %c0_6 = arith.constant 0 : index
    %c0_7 = arith.constant 0 : index
    %c0_8 = arith.constant 0 : index
    %3 = vector.load %arg1[%c0_6, %c0_7, %c0_8] : memref<1x16x64xf32, #tpu.memory_space<vmem>>, vector<1x16x64xf32>
    %4 = vector.shape_cast %3 : vector<1x16x64xf32> to vector<16x64xf32>
    %5 = arith.truncf %4 : vector<16x64xf32> to vector<16x64xbf16>
    %cst = arith.constant dense<0.000000e+00> : vector<192x16xf32>
    %6 = tpu.matmul %0, %5, %cst {dimension_numbers = #tpu.dot_dimension_numbers<[1], [1], [0], [0], [0, 0, 1, 0], [], []>} : vector<192x64xbf16>, vector<16x64xbf16>, vector<192x16xf32> -> vector<192x16xf32>
    %7 = vector.shape_cast %6 : vector<192x16xf32> to vector<12x16x16xf32>
    %8 = tpu.transpose %7, [0, 2, 1] : vector<12x16x16xf32> -> vector<12x16x16xf32>
    %9 = vector.extract_strided_slice %8 {offsets = [0, 0, 0], sizes = [4, 16, 16], strides = [1, 1, 1]} : vector<12x16x16xf32> to vector<4x16x16xf32>
    %10 = arith.truncf %9 : vector<4x16x16xf32> to vector<4x16x16xbf16>
    %11 = vector.extract_strided_slice %8 {offsets = [4, 0, 0], sizes = [4, 16, 16], strides = [1, 1, 1]} : vector<12x16x16xf32> to vector<4x16x16xf32>
    %12 = arith.truncf %11 : vector<4x16x16xf32> to vector<4x16x16xbf16>
    %13 = vector.extract_strided_slice %8 {offsets = [8, 0, 0], sizes = [4, 16, 16], strides = [1, 1, 1]} : vector<12x16x16xf32> to vector<4x16x16xf32>
    %14 = arith.truncf %13 : vector<4x16x16xf32> to vector<4x16x16xbf16>
    "tpu.trace_start"() <{level = 10 : i32, message = "hnd,hmd->hnm"}> : () -> ()
    %cst_9 = arith.constant dense<0.000000e+00> : vector<4x16x16xf32>
    %15 = tpu.matmul %10, %12, %cst_9 {dimension_numbers = #tpu.dot_dimension_numbers<[2], [2], [1], [1], [0, 0, 0, 1, 1, 1], [0], [0]>} : vector<4x16x16xbf16>, vector<4x16x16xbf16>, vector<4x16x16xf32> -> vector<4x16x16xf32>
    "tpu.trace_stop"() : () -> ()
    %cst_10 = arith.constant dense<0xFF800000> : vector<4x16xf32>
    %16 = vector.multi_reduction <maximumf>, %15, %cst_10 [2] : vector<4x16x16xf32> to vector<4x16xf32>
    %17 = vector.shape_cast %16 : vector<4x16xf32> to vector<4x16x1xf32>
    %18 = vector.broadcast %17 : vector<4x16x1xf32> to vector<4x16x16xf32>
    %19 = arith.subf %15, %18 : vector<4x16x16xf32>
    %20 = math.exp %19 : vector<4x16x16xf32>
    %cst_11 = arith.constant dense<0.000000e+00> : vector<4x16xf32>
    %21 = vector.multi_reduction <add>, %20, %cst_11 [2] : vector<4x16x16xf32> to vector<4x16xf32>
    %22 = vector.shape_cast %21 : vector<4x16xf32> to vector<4x16x1xf32>
    %23 = tpu.reciprocal %22 {approx = true} : vector<4x16x1xf32> -> vector<4x16x1xf32>
    %24 = vector.broadcast %23 : vector<4x16x1xf32> to vector<4x16x16xf32>
    %25 = arith.mulf %20, %24 : vector<4x16x16xf32>
    %26 = arith.truncf %25 : vector<4x16x16xf32> to vector<4x16x16xbf16>
    "tpu.trace_start"() <{level = 10 : i32, message = "hnm,hmd->hnd"}> : () -> ()
    %cst_12 = arith.constant dense<0.000000e+00> : vector<4x16x16xf32>
    %27 = tpu.matmul %26, %14, %cst_12 {dimension_numbers = #tpu.dot_dimension_numbers<[2], [1], [1], [2], [0, 0, 0, 1, 1, 2], [0], [0]>} : vector<4x16x16xbf16>, vector<4x16x16xbf16>, vector<4x16x16xf32> -> vector<4x16x16xf32>
    "tpu.trace_stop"() : () -> ()
    %28 = arith.truncf %27 : vector<4x16x16xf32> to vector<4x16x16xbf16>
    "tpu.trace_start"() <{level = 10 : i32, message = "hnd,hdc->hnc"}> : () -> ()
    %cst_13 = arith.constant dense<0.000000e+00> : vector<4x16x64xf32>
    %29 = tpu.matmul %28, %1, %cst_13 {dimension_numbers = #tpu.dot_dimension_numbers<[2], [1], [1], [2], [0, 0, 0, 1, 1, 2], [0], [0]>} : vector<4x16x16xbf16>, vector<4x16x64xbf16>, vector<4x16x64xf32> -> vector<4x16x64xf32>
    "tpu.trace_stop"() : () -> ()
    %cst_14 = arith.constant dense<0.000000e+00> : vector<16x64xf32>
    %30 = vector.multi_reduction <add>, %29, %cst_14 [0] : vector<4x16x64xf32> to vector<16x64xf32>
    %31 = vector.broadcast %2 : vector<1x64xf32> to vector<16x64xf32>
    %32 = arith.addf %30, %31 : vector<16x64xf32>
    %c0_15 = arith.constant 0 : index
    %c0_16 = arith.constant 0 : index
    %c0_17 = arith.constant 0 : index
    %33 = vector.load %arg5[%c0_15, %c0_16, %c0_17] : memref<1x16x64xf32, #tpu.memory_space<vmem>>, vector<1x16x64xf32>
    %34 = vector.shape_cast %33 : vector<1x16x64xf32> to vector<16x64xf32>
    %35 = vector.shape_cast %32 : vector<16x64xf32> to vector<1x16x64xf32>
    tpu.vector_store %arg5[%c0_15, %c0_16, %c0_17], %35 {strides = array<i32>} : memref<1x16x64xf32, #tpu.memory_space<vmem>>, vector<1x16x64xf32>,
    return
  }
  func.func @transform_0(%arg0: i32) -> (i32, i32, i32) {
    %c0_i32 = arith.constant 0 : i32
    %c0_i32_0 = arith.constant 0 : i32
    %c0_i32_1 = arith.constant 0 : i32
    return %arg0, %c0_i32, %c0_i32_0 : i32, i32, i32
  }
  func.func @transform_1(%arg0: i32) -> (i32, i32) {
    %c0_i32 = arith.constant 0 : i32
    %c0_i32_0 = arith.constant 0 : i32
    %c0_i32_1 = arith.constant 0 : i32
    return %c0_i32, %c0_i32_0 : i32, i32
  }
  func.func @transform_2(%arg0: i32) -> (i32, i32, i32) {
    %c0_i32 = arith.constant 0 : i32
    %c0_i32_0 = arith.constant 0 : i32
    %c0_i32_1 = arith.constant 0 : i32
    %c0_i32_2 = arith.constant 0 : i32
    return %c0_i32, %c0_i32_0, %c0_i32_1 : i32, i32, i32
  }
  func.func @transform_3(%arg0: i32) -> (i32, i32) {
    %c0_i32 = arith.constant 0 : i32
    %c0_i32_0 = arith.constant 0 : i32
    %c0_i32_1 = arith.constant 0 : i32
    return %c0_i32, %c0_i32_0 : i32, i32
  }
  func.func @transform_4(%arg0: i32) -> (i32, i32, i32) {
    %c0_i32 = arith.constant 0 : i32
    %c0_i32_0 = arith.constant 0 : i32
    %c0_i32_1 = arith.constant 0 : i32
    return %arg0, %c0_i32, %c0_i32_0 : i32, i32, i32
  }
}

</mosaic_0001>

<bundles_post_ra>
// kernel: tpu_custom_call.1
= control target key start
LH: loop header
LB: loop body
LE: loop exit
PB: predicated region body
PF: predicated region fallthrough
CT: control target
= control target key end

     0   :  { %9 = vsyncpa [#allocation3], 0  ;;  %s2338_s0 = inlined_call_operand.vmem [shape: f32[2,16,64], index: 0, kind: input, shape index: {}]   ;;  %s2339_s1 = inlined_call_operand.vmem [shape: bf16[192,64], index: 1, kind: input, shape index: {}]   ;;  %s2340_s2 = inlined_call_operand.vmem [shape: bf16[4,16,64], index: 2, kind: input, shape index: {}]   ;;  %s2341_s3 = inlined_call_operand.vmem [shape: f32[1,64], index: 3, kind: input, shape index: {}]   ;;  %s2342_s4 = inlined_call_operand.hbm [shape: f32[2,16,64], index: 4, kind: output, shape index: {}]  }
   0x1   :  { %11 = vsyncpa [#allocation3 + $0x1], 0  ;;  %s2051_s15 = smov 0   ;;  %s2053_s16 = smov 0  }
   0x2   :  { %s2055_s17 = smov 0   ;;  %s2057_s18 = smov 0  }
   0x3 LB: > { %s2072_s19 = sadd.s32 4294967295, %s2019_s18   ;;  %s1619_s20 = sadd.s32 4294967294, %s2019_s18   ;;  %s2019_s18 = sphi %s2057_s18, %s2348_s18   ;;  %s2015_s17 = sphi %s2055_s17, %s2347_s17   ;;  %s2011_s16 = sphi %s2053_s16, %s2346_s16   ;;  %s2007_s15 = sphi %s2051_s15, %s2345_s15  }
   0x4   : > { %s2076_s21 = sadd.s32 1, %s2019_s18   ;;  %s113_s22 = sadd.s32 1, %s2015_s17 }
   0x5   : > { %s110_s23 = ssub.s32 %s2019_s18, %s2076_s21  ;;  %p123_p0 = scmp.ne.s32.totalorder %s2015_s17, %s2011_s16 }
   0x6   : > { %p111_p1 = scmp.eq.s32.totalorder %s110_s23, 0  ;;  %p124_p2 = scmp.eq.s32.totalorder %s2072_s19, 1 }
   0x7   : > { %p129_p3 = scmp.ne.s32.totalorder %s2011_s16, %s2007_s15  ;;  %p130_p4 = scmp.eq.s32.totalorder %s1619_s20, 1 }
   0x8   : > { %s2087_s24 = scalar_select %p111_p1, %s2015_s17, %s113_s22  }
   0x9   : > { %p2089_p5 = por %p124_p2, %p123_p0  ;;  %p2093_p6 = por %p130_p4, %p129_p3 }
   0xa   : > { %p1622_p7 = scmp.ge.s32.totalorder %s2019_s18, 1  ;;  %p165_p8 = scmp.lt.s32.totalorder %s2019_s18, 3 }
   0xc   : > { %p166_p9 = pnand %p1622_p7, %p165_p8 }
   0xd   : > { %p191_p10 = scmp.lt.s32.totalorder (!%p166_p9), %s2072_s19, 1  ;;  %v1909_v0 = vld [vmem:[%s2339_s1] sm:$0xff] (!%p166_p9)   ;;  %vm293_vm0 = vcmask (!%p166_p9), 523264   ;;  %v1910_v5 = vld [vmem:[%s2339_s1 + $0x8] sm:$0xff] (!%p166_p9)   ;;  %v1911_v6 = vld [vmem:[%s2339_s1 + $0x10] sm:$0xff] (!%p166_p9)   ;;  %v2021_v29 = vmov (!%p166_p9), 0.0  }
   0xe   : > { %169 = sbr.rel (%p166_p9) target bundleno = 1452 (0x5ac), region = 36  ;;  %1713 = vmatprep.mubr.msk.bf16.mxu0 (!%p166_p9), %vm293_vm0, %v1909_v0  ;;  %v1912_v7 = vld [vmem:[%s2339_s1 + $0x18] sm:$0xff] (!%p166_p9)   ;;  %v1913_v8 = vld [vmem:[%s2339_s1 + $0x20] sm:$0xff] (!%p166_p9)   ;;  %v1914_v9 = vld [vmem:[%s2339_s1 + $0x28] sm:$0xff] (!%p166_p9)   ;;  %1737 = vmatprep.subr.bf16.mxu1 (!%p166_p9), %v2021_v29  ;;  %vm2022_vm1 = vmmov (!%p166_p9), 0   ;;  %vm858_vm2 = vcmask (!%p166_p9), 130048  }
   0xf   : > { %v1915_v10 = vld [vmem:[%s2339_s1 + $0x30] sm:$0xff] (!%p166_p9)   ;;  %v1916_v11 = vld [vmem:[%s2339_s1 + $0x38] sm:$0xff] (!%p166_p9)   ;;  %1739 = vmatprep.mubr.msk.bf16.mxu1 (!%p166_p9), %vm2022_vm1, %v2021_v29  ;;  %v1917_v35 = vld [vmem:[%s2339_s1 + $0x40] sm:$0xff] (!%p166_p9)   ;;  %s1673_s8 = sshll.u32 (!%p166_p9), %s2072_s19, 8  ;;  %s2023_s20 = smov (!%p166_p9), [#allocation2]  }
  0x10   : > { %v1918_v36 = vld [vmem:[%s2339_s1 + $0x48] sm:$0xff] (!%p166_p9)   ;;  %s2289_s13 = scalar_lea.hbm (!%p166_p9), %s2342_s4, %s1673_s8  ;;  %s1961_s22 = sshll.u32 (!%p166_p9), %s2023_s20, 4  ;;  %s1962_s22 = int_to_ptr.vmem [resolvable:$false] %s1961_s22 }
  0x11   : > { %s1963_s23 = scalar_lea.vmem (!%p166_p9), %s1962_s22, 512 }
  0x15   : > { %s192_s29 = scalar_select %p191_p10, %s2072_s19, 1 }
  0x17   : > { %s1672_s30 = sshll.u32 %s192_s29, 4 }
  0x18   : > { %s195_s7 = scalar_lea.vmem %s2338_s0, %s1672_s30  ;;  %s188_s30 = sand.u32 1, %s2011_s16  }
  0x19   : > { %v230_v1 = vld [vmem:[%s195_s7] sm:$0xff]  ;;  %v231_v2 = vld [vmem:[%s195_s7 + $0x8] sm:$0xff]  ;;  %s1623_s5 = sshll.u32 %s188_s30, 4  ;;  %s2297_s19 = scalar_lea.sflag [#allocation3], %s188_s30 }
  0x1a   : > { %v232_v3 = vpack.c.bf16 %v231_v2, %v230_v1  ;;  %s190_s9 = scalar_lea.vmem [#allocation2], %s1623_s5 }
  0x1b   : > { %s1557_s10 = sshll.u32 %s190_s9, 4  ;;  %s2291_s10 = int_to_ptr.vmem [resolvable:$true] %s1557_s10 }
  0x1c   : > { %1809 = vmatprep.subr.msk.bf16.mxu0 %vm293_vm0, %v232_v3  ;;  %v331_v4 = vsel %vm293_vm0, %v232_v3, 0  ;;  %s1957_s14 = scalar_lea.vmem %s2291_s10, 256  ;;  %p1964_p0 = scmp.lt.s32.totalorder %s2291_s10, %s1962_s22 }
  0x1d   : > { %1712 = vmatpush3.bf16.xpose.msra.mxu0 %v331_v4  ;;  %p1958_p11 = scmp.ne.s32.totalorder %s2291_s10, %s1957_s14  ;;  %p1965_p1 = scmp.lt.s32.totalorder %s1963_s23, %s1957_s14 }
  0x1e   : > { %1773 = vmatprep.subr.bf16.mxu0 %v2021_v29 }
  0x1f   : > { %p1959_p12 = pnand %p1958_p11, %p2089_p5  ;;  %p1966_p2 = por %p1965_p1, %p1964_p0 }
  0x21   : > { %p1960_p13 = pneg %p1959_p12 }
  0x23   : > { %p1967_p3 = pnand %p1966_p2, %p1960_p13 }
  0x24   : > { %1714 = vmatmul.mubr.msk.bf16.vlgmr.msra.gmra.mrb[0].mxu0 %vm293_vm0, %v1910_v5 }
  0x25   : > { %1717 = vmatprep.mubr.msk.bf16.mxu0 %vm293_vm0, %v1911_v6 }
  0x2c   : > { %1718 = vmatmul.mubr.msk.bf16.gmra.mrb[4].mxu0 %vm293_vm0, %v1912_v7  ;;  %v1919_v7 = vld [vmem:[%s2339_s1 + $0x50] sm:$0xff]  }
  0x2d   : > { %1721 = vmatprep.mubr.msk.bf16.mxu0 %vm293_vm0, %v1913_v8  ;;  %v1920_v8 = vld [vmem:[%s2339_s1 + $0x58] sm:$0xff]  }
  0x34   : > { %1722 = vmatmul.mubr.msk.bf16.gmra.mrb[8].mxu0 %vm293_vm0, %v1914_v9 }
  0x35   : > { %1725 = vmatprep.mubr.msk.bf16.mxu0 %vm293_vm0, %v1915_v10 }
  0x3c   : > { %1726 = vmatmul.mubr.msk.bf16.gmra.mrb[12].mxu0 %vm293_vm0, %v1916_v11 }
  0x3d   : > { %1729 = vmatprep.mubr.msk.bf16.mxu0 %vm293_vm0, %v1917_v35 }
  0x44   : > { %1730 = vmatmul.mubr.msk.bf16.gmra.mrb[16].mxu0 %vm293_vm0, %v1918_v36 }
  0x45   : > { %1733 = vmatprep.mubr.msk.bf16.mxu0 %vm293_vm0, %v1919_v7 }
  0x4c   : > { %1734 = vmatmul.mubr.msk.bf16.gmra.mrb[20].mxu0 %vm293_vm0, %v1920_v8 }
  0x4d   : > { %1775 = vmatprep.mubr.msk.bf16.mxu0 %vm2022_vm1, %v2021_v29 }
  0xf7   : > { %v1715_v12 = vpop.f32.mrb[0].mxu0 }
  0xf8   : > { %v367_v13 = vpop.f32.mrb[1].mxu0 }
  0xf9   : > { %v1716_v14 = vpop.f32.mrb[2].mxu0 }
  0xfa   : > { %v370_v15 = vpop.f32.mrb[3].mxu0 }
  0xff   : > { %v1719_v16 = vpop.f32.mrb[4].mxu0 }
 0x100   : > { %v383_v17 = vpop.f32.mrb[5].mxu0 }
 0x101   : > { %v1720_v18 = vpop.f32.mrb[6].mxu0 }
 0x102   : > { %v386_v19 = vpop.f32.mrb[7].mxu0 }
 0x107   : > { %v1723_v20 = vpop.f32.mrb[8].mxu0 }
 0x108   : > { %v399_v21 = vpop.f32.mrb[9].mxu0  ;;  %v1853_v22 = vpack.i.bf16 %v1723_v20, %v367_v13 }
 0x109   : > { %590 = vxpose.xlu0.b32.start [1/2] (short) (narrow) %v399_v21, 16  ;;  %v1724_v23 = vpop.f32.mrb[10].mxu0 }
 0x10a   : > { %v1855_v24 = vpack.i.bf16 %v1724_v23, %v370_v15  ;;  %1854 = vxpose.xlu1.b32.start [1/2] (short) (narrow) %v1853_v22, 16  ;;  %v402_v25 = vpop.f32.mrb[11].mxu0 }
 0x10d   : > { %591 = vxpose.xlu0.b32.end [2/2] (short) (narrow) %v402_v25, 16 }
 0x10e   : > { %1856 = vxpose.xlu1.b32.end [2/2] (short) (narrow) %v1855_v24, 16 }
 0x10f   : > { %v1727_v26 = vpop.f32.mrb[12].mxu0 }
 0x110   : > { %v1881_v27 = vpack.i.bf16 %v1727_v26, %v383_v17  ;;  %v415_v28 = vpop.f32.mrb[13].mxu0 }
 0x111   : > { %v1867_v30 = vpack.i.bf16 %v415_v28, %v1715_v12  ;;  %v1728_v31 = vpop.f32.mrb[14].mxu0 }
 0x112   : > { %v1883_v32 = vpack.i.bf16 %v1728_v31, %v386_v19  ;;  %1882 = vxpose.xlu1.b32.start [1/2] (short) (narrow) %v1881_v27, 16  ;;  %v418_v33 = vpop.f32.mrb[15].mxu0 }
 0x113   : > { %v1869_v34 = vpack.i.bf16 %v418_v33, %v1716_v14  ;;  %1868 = vxpose.xlu0.b32.start [1/2] (short) (narrow) %v1867_v30, 16 }
 0x116   : > { %1884 = vxpose.xlu1.b32.end [2/2] (short) (narrow) %v1883_v32, 16 }
 0x117   : > { %1870 = vxpose.xlu0.b32.end [2/2] (short) (narrow) %v1869_v34, 16  ;;  %v2180_v9 = vpop.f32.mrb[16].mxu0 }
 0x118   : > { %v431_v10 = vpop.f32.mrb[17].mxu0 }
 0x119   : > { %v2182_v11 = vpop.f32.mrb[18].mxu0 }
 0x11a   : > { %v434_v12 = vpop.f32.mrb[19].mxu0 }
 0x11b   : > { %558 = vxpose.xlu0.b32.start [1/2] (short) (narrow) %v1719_v16, 16 }
 0x11f   : > { %559 = vxpose.xlu0.b32.end [2/2] (short) (narrow) %v1720_v18, 16 }
 0x189   : > { %v606_v37 = vpop.trf.xlu0 }
 0x18a   : > { %v1857_v38 = vpop.trf.xlu1 }
 0x18b   : > { %v1861_v42 = vunpack.i.h.bf16 %v1857_v38  ;;  %v1858_v45 = vunpack.i.l.bf16 %v1857_v38  ;;  %v2192_v38 = vpop.f32.mrb[20].mxu0 }
 0x18d   : > { %v607_v39 = vpop.trf.xlu0 }
 0x18e   : > { %v850_v40 = vpack.c.bf16 %v607_v39, %v606_v37  ;;  %v1862_v41 = vpop.trf.xlu1  ;;  %v2194_v39 = vpop.f32.mrb[21].mxu0 }
 0x18f   : > { %v1866_v43 = vunpack.i.h.bf16 %v1862_v41  ;;  %v1863_v46 = vunpack.i.l.bf16 %v1862_v41  ;;  %v2198_v41 = vpop.f32.mrb[22].mxu0 }
 0x190   : > { %v863_v44 = vsel %vm858_vm2, %v850_v40, 0  ;;  %v1895_v40 = vpack.i.bf16 %v2192_v38, %v2194_v39 }
 0x191   : > { %1738 = vmatpush3.bf16.xpose.msra.mxu1 %v863_v44  ;;  %v851_v49 = vpack.c.bf16 %v1866_v43, %v1861_v42  ;;  %v846_v50 = vpack.c.bf16 %v1863_v46, %v1858_v45  ;;  %v2200_v42 = vpop.f32.mrb[23].mxu0 }
 0x192   : > { %1743 = vmatprep.subr.bf16.mxu1 %v2021_v29  ;;  %v1885_v47 = vpop.trf.xlu1  ;;  %v1897_v43 = vpack.i.bf16 %v2198_v41, %v2200_v42 }
 0x193   : > { %v1871_v48 = vpop.trf.xlu0  ;;  %v910_v53 = vsel %vm858_vm2, %v851_v49, 0  ;;  %v1889_v60 = vunpack.i.h.bf16 %v1885_v47  ;;  %v1886_v63 = vunpack.i.l.bf16 %v1885_v47 }
 0x194   : > { %v1875_v54 = vunpack.i.h.bf16 %v1871_v48  ;;  %v1872_v56 = vunpack.i.l.bf16 %v1871_v48 }
 0x196   : > { %v1890_v51 = vpop.trf.xlu1 }
 0x197   : > { %v1876_v52 = vpop.trf.xlu0  ;;  %v1894_v61 = vunpack.i.h.bf16 %v1890_v51  ;;  %v1891_v0 = vunpack.i.l.bf16 %v1890_v51 }
 0x198   : > { %v1880_v55 = vunpack.i.h.bf16 %v1876_v52  ;;  %1740 = vmatmul.mubr.msk.bf16.vlgmr.msra.gmra.mrb[0].mxu1 %vm858_vm2, %v846_v50  ;;  %v1877_v57 = vunpack.i.l.bf16 %v1876_v52 }
 0x199   : > { %1744 = vmatpush3.bf16.xpose.msra.mxu1 %v910_v53  ;;  %1745 = vmatprep.mubr.msk.bf16.mxu1 %vm2022_vm1, %v2021_v29  ;;  %v853_v1 = vpack.c.bf16 %v1894_v61, %v1889_v60  ;;  %v848_v3 = vpack.c.bf16 %v1891_v0, %v1886_v63 }
 0x19a   : > { %1749 = vmatprep.subr.bf16.mxu1 %v2021_v29  ;;  %v852_v58 = vpack.c.bf16 %v1880_v55, %v1875_v54  ;;  %v847_v59 = vpack.c.bf16 %v1877_v57, %v1872_v56 }
 0x19b   : > { %v574_v2 = vpop.trf.xlu0  ;;  %v1004_v4 = vsel %vm858_vm2, %v853_v1, 0 }
 0x19c   : > { %v957_v62 = vsel %vm858_vm2, %v852_v58, 0 }
 0x19f   : > { %v575_v5 = vpop.trf.xlu0 }
 0x1a0   : > { %1746 = vmatmul.mubr.msk.bf16.vlgmr.msra.gmra.mrb[4].mxu1 %vm858_vm2, %v847_v59  ;;  %v849_v6 = vpack.c.bf16 %v575_v5, %v574_v2 }
 0x1a1   : > { %1750 = vmatpush3.bf16.xpose.msra.mxu1 %v957_v62  ;;  %1751 = vmatprep.mubr.msk.bf16.mxu1 %vm2022_vm1, %v2021_v29 }
 0x1a2   : > { %1755 = vmatprep.subr.bf16.mxu1 %v2021_v29 }
 0x1a8   : > { %1752 = vmatmul.mubr.msk.bf16.vlgmr.msra.gmra.mrb[8].mxu1 %vm858_vm2, %v848_v3 }
 0x1a9   : > { %1756 = vmatpush3.bf16.xpose.msra.mxu1 %v1004_v4  ;;  %1757 = vmatprep.mubr.msk.bf16.mxu1 %vm2022_vm1, %v2021_v29 }
 0x1aa   : > { %1761 = vmatprep.subr.bf16.mxu1 %v2021_v29 }
 0x1b0   : > { %1758 = vmatmul.mubr.msk.bf16.vlgmr.msra.gmra.mrb[12].mxu1 %vm858_vm2, %v849_v6 }
 0x1b1   : > { %1763 = vmatprep.mubr.msk.bf16.mxu1 %vm2022_vm1, %v2021_v29 }
 0x26b   : > { %v899_v13 = vpop.f32.mrb[0].mxu1 }
 0x26c   : > { %v1741_v14 = vpop.f32.mrb[1].mxu1  ;;  %v1047_v15 = vsel %vm858_vm2, %v899_v13, -inf }
 0x26d   : > { %v902_v16 = vpop.f32.mrb[2].mxu1  ;;  %1048 = vmax.xlane.f32.xlu1 %v1047_v15 }
 0x26e   : > { %v1742_v17 = vpop.f32.mrb[3].mxu1  ;;  %v1050_v18 = vsel %vm858_vm2, %v902_v16, -inf }
 0x26f   : > { %1051 = vmax.xlane.f32.xlu0 %v1050_v18 }
 0x273   : > { %v946_v19 = vpop.f32.mrb[4].mxu1 }
 0x274   : > { %v1747_v20 = vpop.f32.mrb[5].mxu1  ;;  %v1053_v21 = vsel %vm858_vm2, %v946_v19, -inf }
 0x275   : > { %1054 = vmax.xlane.f32.xlu1 %v1053_v21  ;;  %v949_v22 = vpop.f32.mrb[6].mxu1 }
 0x276   : > { %v1748_v23 = vpop.f32.mrb[7].mxu1  ;;  %v1056_v24 = vsel %vm858_vm2, %v949_v22, -inf }
 0x279   : > { %1057 = vmax.xlane.f32.xlu1 %v1056_v24 }
 0x27b   : > { %v993_v25 = vpop.f32.mrb[8].mxu1 }
 0x27c   : > { %v1753_v26 = vpop.f32.mrb[9].mxu1  ;;  %v1059_v27 = vsel %vm858_vm2, %v993_v25, -inf }
 0x27d   : > { %1060 = vmax.xlane.f32.xlu1 %v1059_v27  ;;  %v996_v28 = vpop.f32.mrb[10].mxu1 }
 0x27e   : > { %v1754_v30 = vpop.f32.mrb[11].mxu1  ;;  %v1062_v31 = vsel %vm858_vm2, %v996_v28, -inf }
 0x281   : > { %1063 = vmax.xlane.f32.xlu1 %v1062_v31 }
 0x283   : > { %v1040_v32 = vpop.f32.mrb[12].mxu1 }
 0x284   : > { %v1759_v33 = vpop.f32.mrb[13].mxu1  ;;  %v1065_v34 = vsel %vm858_vm2, %v1040_v32, -inf }
 0x285   : > { %1066 = vmax.xlane.f32.xlu0 %v1065_v34  ;;  %v1043_v35 = vpop.f32.mrb[14].mxu1 }
 0x286   : > { %v1760_v36 = vpop.f32.mrb[15].mxu1  ;;  %v1068_v37 = vsel %vm858_vm2, %v1043_v35, -inf }
 0x287   : > { %1069 = vmax.xlane.f32.xlu1 %v1068_v37 }
 0x2b2   : > { %718 = vxpose.xlu0.b32.start [1/2] (short) (narrow) %v431_v10, 16 }
 0x2b6   : > { %719 = vxpose.xlu0.b32.end [2/2] (short) (narrow) %v434_v12, 16 }
 0x2fa   : > { %v1049_v44 = vpop.xlane.xlu1 %1048 }
 0x2fb   : > { %v1071_v45 = vsub.f32 %v899_v13, %v1049_v44 }
 0x2fc   : > { %v1052_v46 = vpop.xlane.xlu0 %1051 }
 0x2fd   : > { %v1079_v47 = vmul.f32 1.442695, %v1071_v45  ;;  %v1072_v48 = vsub.f32 %v902_v16, %v1052_v46 }
 0x2ff   : > { %1925 = vpow2.f32 %v1079_v47  ;;  %v1081_v49 = vmul.f32 1.442695, %v1072_v48 }
 0x301   : > { %1927 = vpow2.f32 %v1081_v49 }
 0x302   : > { %v1055_v50 = vpop.xlane.xlu1 %1054 }
 0x303   : > { %v1073_v51 = vsub.f32 %v946_v19, %v1055_v50 }
 0x305   : > { %v1083_v52 = vmul.f32 1.442695, %v1073_v51 }
 0x306   : > { %v1058_v53 = vpop.xlane.xlu1 %1057 }
 0x307   : > { %1929 = vpow2.f32 %v1083_v52  ;;  %v1074_v54 = vsub.f32 %v949_v22, %v1058_v53 }
 0x309   : > { %v1926_v55 = vpop.eup %1925  ;;  %v1085_v56 = vmul.f32 1.442695, %v1074_v54 }
 0x30a   : > { %v1061_v57 = vpop.xlane.xlu1 %1060  ;;  %v1095_v58 = vsel %vm858_vm2, %v1926_v55, 0.0 }
 0x30b   : > { %v1928_v59 = vpop.eup %1927  ;;  %1931 = vpow2.f32 %v1085_v56  ;;  %v1075_v60 = vsub.f32 %v993_v25, %v1061_v57  ;;  %1096 = vadd.xlane.f32.xlu0 %v1095_v58 }
 0x30c   : > { %v1098_v61 = vsel %vm858_vm2, %v1928_v59, 0.0 }
 0x30d   : > { %v1087_v62 = vmul.f32 1.442695, %v1075_v60  ;;  %1099 = vadd.xlane.f32.xlu1 %v1098_v61 }
 0x30e   : > { %v1064_v63 = vpop.xlane.xlu1 %1063 }
 0x30f   : > { %1933 = vpow2.f32 %v1087_v62  ;;  %v1076_v0 = vsub.f32 %v996_v28, %v1064_v63  ;;  %v1921_v63 = vld [vmem:[%s2340_s2] sm:$0xff]  }
 0x311   : > { %v2206_v1 = vpop.eup %1929  ;;  %v1089_v2 = vmul.f32 1.442695, %v1076_v0  ;;  %v1923_v0 = vld [vmem:[%s2340_s2 + $0x8] sm:$0xff]  }
 0x312   : > { %v1067_v3 = vpop.xlane.xlu0 %1066  ;;  %v1101_v4 = vsel %vm858_vm2, %v2206_v1, 0.0 }
 0x313   : > { %1935 = vpow2.f32 %v1089_v2  ;;  %v1077_v5 = vsub.f32 %v1040_v32, %v1067_v3  ;;  %1102 = vadd.xlane.f32.xlu0 %v1101_v4  ;;  %v1922_v4 = vld [vmem:[%s2340_s2 + $0x10] sm:$0xff]  }
 0x314   : > { %v1070_v6 = vpop.xlane.xlu1 %1069 }
 0x315   : > { %v2210_v7 = vpop.eup %1931  ;;  %v1091_v8 = vmul.f32 1.442695, %v1077_v5  ;;  %v1078_v10 = vsub.f32 %v1043_v35, %v1070_v6 }
 0x316   : > { %v1104_v12 = vsel %vm858_vm2, %v2210_v7, 0.0 }
 0x317   : > { %1937 = vpow2.f32 %v1091_v8  ;;  %v1093_v13 = vmul.f32 1.442695, %v1078_v10  ;;  %1105 = vadd.xlane.f32.xlu1 %v1104_v12 }
 0x319   : > { %v1934_v14 = vpop.eup %1933  ;;  %1939 = vpow2.f32 %v1093_v13 }
 0x31a   : > { %v1107_v15 = vsel %vm858_vm2, %v1934_v14, 0.0 }
 0x31b   : > { %1108 = vadd.xlane.f32.xlu0 %v1107_v15 }
 0x31d   : > { %v1936_v16 = vpop.eup %1935 }
 0x31e   : > { %v1110_v17 = vsel %vm858_vm2, %v1936_v16, 0.0 }
 0x31f   : > { %1111 = vadd.xlane.f32.xlu1 %v1110_v17  ;;  %v1924_v17 = vld [vmem:[%s2340_s2 + $0x18] sm:$0xff]  }
 0x321   : > { %v2216_v18 = vpop.eup %1937 }
 0x322   : > { %v1113_v19 = vsel %vm858_vm2, %v2216_v18, 0.0 }
 0x323   : > { %v2220_v20 = vpop.eup %1939  ;;  %1114 = vadd.xlane.f32.xlu0 %v1113_v19 }
 0x324   : > { %v1116_v21 = vsel %vm858_vm2, %v2220_v20, 0.0 }
 0x325   : > { %1117 = vadd.xlane.f32.xlu1 %v1116_v21 }
 0x332   : > { %v734_v22 = vpop.trf.xlu0 }
 0x336   : > { %v735_v23 = vpop.trf.xlu0 }
 0x337   : > { %v854_v24 = vpack.c.bf16 %v735_v23, %v734_v22 }
 0x339   : > { %1762 = vmatpush3.bf16.msra.mxu1 %v854_v24 }
 0x33a   : > { %1767 = vmatprep.subr.bf16.mxu1 %v2021_v29 }
 0x350   : > { %1896 = vxpose.xlu0.b32.start [1/2] (short) (narrow) %v1895_v40, 16 }
 0x354   : > { %1898 = vxpose.xlu0.b32.end [2/2] (short) (narrow) %v1897_v43, 16 }
 0x358   : > { %750 = vxpose.xlu1.b32.start [1/2] (short) (narrow) %v2180_v9, 16 }
 0x35c   : > { %751 = vxpose.xlu1.b32.end [2/2] (short) (narrow) %v2182_v11, 16 }
 0x398   : > { %v1097_v25 = vpop.xlane.xlu0 %1096 }
 0x399   : > { %1941 = vrcp.f32 %v1097_v25 }
 0x39a   : > { %v1100_v26 = vpop.xlane.xlu1 %1099 }
 0x39b   : > { %1943 = vrcp.f32 %v1100_v26 }
 0x3a0   : > { %v1103_v34 = vpop.xlane.xlu0 %1102 }
 0x3a3   : > { %v1942_v27 = vpop.eup %1941 }
 0x3a4   : > { %v1127_v30 = vmul.f32 %v1942_v27, %v1926_v55  ;;  %v1106_v33 = vpop.xlane.xlu1 %1105 }
 0x3a5   : > { %v1944_v28 = vpop.eup %1943 }
 0x3a6   : > { %v1128_v31 = vmul.f32 %v1944_v28, %v1928_v59 }
 0x3a8   : > { %v1135_v32 = vpack.c.bf16 %v1128_v31, %v1127_v30  ;;  %v1109_v9 = vpop.xlane.xlu0 %1108 }
 0x3aa   : > { %1764 = vmatmul.mubr.msk.bf16.vlgmr.msra.gmra.mrb[16].mxu1 %vm858_vm2, %v1135_v32 }
 0x3ab   : > { %1769 = vmatprep.mubr.msk.bf16.mxu1 %vm2022_vm1, %v2021_v29 }
 0x3ac   : > { %v1112_v35 = vpop.xlane.xlu1 %1111 }
 0x3ad   : > { %1945 = vrcp.f32 %v1112_v35 }
 0x3ae   : > { %1947 = vrcp.f32 %v1109_v9 }
 0x3af   : > { %1949 = vrcp.f32 %v1106_v33 }
 0x3b0   : > { %v1115_v11 = vpop.xlane.xlu0 %1114  ;;  %1951 = vrcp.f32 %v1103_v34 }
 0x3b2   : > { %v1118_v39 = vpop.xlane.xlu1 %1117 }
 0x3b3   : > { %1953 = vrcp.f32 %v1118_v39 }
 0x3b4   : > { %1955 = vrcp.f32 %v1115_v11 }
 0x3b7   : > { %v1946_v37 = vpop.eup %1945 }
 0x3b8   : > { %v1948_v41 = vpop.eup %1947  ;;  %v1132_v43 = vmul.f32 %v1946_v37, %v1936_v16 }
 0x3b9   : > { %v1131_v45 = vmul.f32 %v1948_v41, %v1934_v14  ;;  %v1950_v47 = vpop.eup %1949 }
 0x3ba   : > { %v1952_v49 = vpop.eup %1951  ;;  %v1130_v50 = vmul.f32 %v1950_v47, %v2210_v7 }
 0x3bb   : > { %v1137_v48 = vpack.c.bf16 %v1132_v43, %v1131_v45  ;;  %v1129_v55 = vmul.f32 %v1952_v49, %v2206_v1 }
 0x3bd   : > { %v1136_v56 = vpack.c.bf16 %v1130_v50, %v1129_v55  ;;  %v1954_v57 = vpop.eup %1953 }
 0x3be   : > { %v1956_v59 = vpop.eup %1955  ;;  %v1134_v60 = vmul.f32 %v1954_v57, %v2220_v20 }
 0x3bf   : > { %v1133_v61 = vmul.f32 %v1956_v59, %v2216_v18 }
 0x3c1   : > { %v1138_v62 = vpack.c.bf16 %v1134_v60, %v1133_v61 }
 0x3d0   : > { %v1899_v36 = vpop.trf.xlu0 }
 0x3d1   : > { %v1900_v38 = vunpack.i.l.bf16 %v1899_v36  ;;  %v1903_v52 = vunpack.i.h.bf16 %v1899_v36 }
 0x3d4   : > { %v1904_v40 = vpop.trf.xlu0 }
 0x3d5   : > { %v1905_v42 = vunpack.i.l.bf16 %v1904_v40  ;;  %v1908_v53 = vunpack.i.h.bf16 %v1904_v40 }
 0x3d7   : > { %v856_v44 = vpack.c.bf16 %v1905_v42, %v1900_v38  ;;  %v857_v58 = vpack.c.bf16 %v1908_v53, %v1903_v52 }
 0x3d8   : > { %v766_v46 = vpop.trf.xlu1 }
 0x3d9   : > { %1774 = vmatpush3.bf16.msra.mxu0 %v856_v44 }
 0x3da   : > { %1785 = vmatprep.subr.bf16.mxu0 %v2021_v29 }
 0x3dc   : > { %v767_v51 = vpop.trf.xlu1  ;;  %1776 = vmatmul.mubr.msk.bf16.vlgmr.msra.gmra.mrb[24].mxu0 %vm858_vm2, %v1137_v48 }
 0x3dd   : > { %v855_v54 = vpack.c.bf16 %v767_v51, %v766_v46  ;;  %1787 = vmatprep.mubr.msk.bf16.mxu0 %vm2022_vm1, %v2021_v29  ;;  %1786 = vmatpush3.bf16.msra.mxu0 %v1921_v63  ;;  %v1666_v46 = vld [vmem:[%s2341_s3] ss:$0 sm:$0xff] }
 0x3de   : > { %1797 = vmatprep.subr.bf16.mxu0 %v2021_v29 }
 0x3df   : > { %1768 = vmatpush3.bf16.msra.mxu1 %v855_v54 }
 0x3e0   : > { %1779 = vmatprep.subr.bf16.mxu1 %v2021_v29 }
 0x3e2   : > { %1770 = vmatmul.mubr.msk.bf16.vlgmr.msra.gmra.mrb[20].mxu1 %vm858_vm2, %v1136_v56 }
 0x3e3   : > { %1780 = vmatpush3.bf16.msra.mxu1 %v857_v58  ;;  %1781 = vmatprep.mubr.msk.bf16.mxu1 %vm2022_vm1, %v2021_v29 }
 0x3e4   : > { %1791 = vmatprep.subr.bf16.mxu1 %v2021_v29 }
 0x3ea   : > { %1782 = vmatmul.mubr.msk.bf16.vlgmr.msra.gmra.mrb[24].mxu1 %vm858_vm2, %v1138_v62 }
 0x3eb   : > { %1793 = vmatprep.mubr.msk.bf16.mxu1 %vm2022_vm1, %v2021_v29  ;;  %1792 = vmatpush3.bf16.msra.mxu1 %v1923_v0 }
 0x3ec   : > { %1803 = vmatprep.subr.bf16.mxu1 %v2021_v29 }
 0x47d   : > { %v1176_v1 = vpop.f32.mrb[16].mxu1 }
 0x47e   : > { %v1765_v2 = vpop.f32.mrb[17].mxu1 }
 0x47f   : > { %v1179_v3 = vpop.f32.mrb[18].mxu1 }
 0x480   : > { %v1315_v5 = vpack.c.bf16 %v1179_v3, %v1176_v1  ;;  %v1766_v6 = vpop.f32.mrb[19].mxu1 }
 0x482   : > { %1788 = vmatmul.mubr.msk.bf16.vlgmr.msra.gmra.mrb[28].mxu0 %vm858_vm2, %v1315_v5 }
 0x483   : > { %1798 = vmatpush3.bf16.msra.mxu0 %v1922_v4  ;;  %1799 = vmatprep.mubr.msk.bf16.mxu0 %vm2022_vm1, %v2021_v29 }
 0x4af   : > { %v1264_v7 = vpop.f32.mrb[24].mxu0 }
 0x4b0   : > { %v1777_v8 = vpop.f32.mrb[25].mxu0 }
 0x4b1   : > { %v1267_v10 = vpop.f32.mrb[26].mxu0 }
 0x4b2   : > { %v1317_v12 = vpack.c.bf16 %v1267_v10, %v1264_v7  ;;  %v1778_v13 = vpop.f32.mrb[27].mxu0 }
 0x4b4   : > { %1800 = vmatmul.mubr.msk.bf16.vlgmr.msra.gmra.mrb[32].mxu0 %vm858_vm2, %v1317_v12 }
 0x4b5   : > { %v1220_v14 = vpop.f32.mrb[20].mxu1 }
 0x4b6   : > { %v1771_v15 = vpop.f32.mrb[21].mxu1 }
 0x4b7   : > { %v1223_v16 = vpop.f32.mrb[22].mxu1 }
 0x4b8   : > { %v1316_v18 = vpack.c.bf16 %v1223_v16, %v1220_v14  ;;  %v1772_v19 = vpop.f32.mrb[23].mxu1 }
 0x4ba   : > { %1794 = vmatmul.mubr.msk.bf16.vlgmr.msra.gmra.mrb[28].mxu1 %vm858_vm2, %v1316_v18 }
 0x4bb   : > { %1804 = vmatpush3.bf16.msra.mxu1 %v1924_v17  ;;  %1805 = vmatprep.mubr.msk.bf16.mxu1 %vm2022_vm1, %v2021_v29 }
 0x4bd   : > { %v1308_v20 = vpop.f32.mrb[24].mxu1 }
 0x4be   : > { %v1783_v21 = vpop.f32.mrb[25].mxu1 }
 0x4bf   : > { %v1311_v22 = vpop.f32.mrb[26].mxu1 }
 0x4c0   : > { %v1318_v23 = vpack.c.bf16 %v1311_v22, %v1308_v20  ;;  %v1784_v24 = vpop.f32.mrb[27].mxu1 }
 0x4c2   : > { %1806 = vmatmul.mubr.msk.bf16.vlgmr.msra.gmra.mrb[32].mxu1 %vm858_vm2, %v1318_v23 }
 0x555   : > { %v1362_v25 = vpop.f32.mrb[28].mxu0 }
 0x556   : > { %v1789_v26 = vpop.f32.mrb[29].mxu0  ;;  %v1519_v29 = vsel %vm293_vm0, %v1362_v25, 0.0 }
 0x557   : > { %v1365_v27 = vpop.f32.mrb[30].mxu0 }
 0x558   : > { %v1790_v28 = vpop.f32.mrb[31].mxu0  ;;  %v1526_v37 = vsel %vm293_vm0, %v1365_v27, 0.0 }
 0x587   : > { %v1462_v30 = vpop.f32.mrb[32].mxu0 }
 0x588   : > { %v1801_v31 = vpop.f32.mrb[33].mxu0  ;;  %v1522_v38 = vsel %vm293_vm0, %v1462_v30, 0.0 }
 0x589   : > { %v1465_v32 = vpop.f32.mrb[34].mxu0 }
 0x58a   : > { %v1802_v33 = vpop.f32.mrb[35].mxu0  ;;  %v1529_v43 = vsel %vm293_vm0, %v1465_v32, 0.0 }
 0x58d   : > { %v1412_v34 = vpop.f32.mrb[28].mxu1 }
 0x58e   : > { %v1520_v35 = vsel %vm293_vm0, %v1412_v34, 0.0  ;;  %v1795_v9 = vpop.f32.mrb[29].mxu1 }
 0x58f   : > { %v1521_v11 = vadd.f32 %v1520_v35, %v1519_v29  ;;  %v1415_v36 = vpop.f32.mrb[30].mxu1 }
 0x590   : > { %v1527_v39 = vsel %vm293_vm0, %v1415_v36, 0.0  ;;  %v1796_v40 = vpop.f32.mrb[31].mxu1 }
 0x591   : > { %v1528_v41 = vadd.f32 %v1527_v39, %v1526_v37  ;;  %v1523_v42 = vadd.f32 %v1522_v38, %v1521_v11 }
 0x593   : > { %v1530_v44 = vadd.f32 %v1529_v43, %v1528_v41 }
 0x595   : > { %v1512_v45 = vpop.f32.mrb[32].mxu1 }
 0x596   : > { %v1524_v47 = vsel %vm293_vm0, %v1512_v45, 0.0  ;;  %v1807_v48 = vpop.f32.mrb[33].mxu1 }
 0x597   : > { %v1525_v49 = vadd.f32 %v1524_v47, %v1523_v42  ;;  %v1515_v50 = vpop.f32.mrb[34].mxu1 }
 0x598   : > { %v1531_v51 = vsel %vm293_vm0, %v1515_v50, 0.0  ;;  %v1808_v52 = vpop.f32.mrb[35].mxu1 }
 0x599   : > { %v1539_v53 = vadd.f32 %v1666_v46, %v1525_v49  ;;  %v1532_v54 = vadd.f32 %v1531_v51, %v1530_v44 }
 0x59b   : > { %1541 = vst.msk [vmem:[%s190_s9] sm:$0xff] %vm293_vm0, %v1539_v53  ;;  %v1540_v55 = vadd.f32 %v1666_v46, %v1532_v54 }
 0x59d   : > { %1542 = vst.msk [vmem:[%s190_s9 + $0x8] sm:$0xff] %vm293_vm0, %v1540_v55 }
 0x59e   : > { %1970 = shalt.err (!%p1967_p3)
}
 0x59f   : > { %s1971_s27 = scalar_lea.hbm %s2289_s13, 256  ;;  %s1975_s30 = scalar_lea.hbm %s2342_s4, 512 }
 0x5a0   : > { %p1972_p4 = scmp.ne.s32.totalorder %s2289_s13, %s1971_s27  ;;  %p1976_p9 = scmp.lt.u32.totalorder %s2289_s13, %s2342_s4 }
 0x5a1   : > { %p1977_p10 = scmp.lt.u32.totalorder %s1975_s30, %s1971_s27  ;;  %p1979_p12 = scmp.lt.u32.totalorder %s1971_s27, %s2289_s13 }
 0x5a2   : > { %p1973_p7 = pnand %p1972_p4, %p2089_p5 }
 0x5a3   : > { %p1978_p11 = por %p1977_p10, %p1976_p9 }
 0x5a4   : > { %p1974_p8 = pneg %p1973_p7 }
 0x5a5   : > { %p1980_p13 = por %p1979_p12, %p1978_p11 }
 0x5a7   : > { %p1981_p0 = pnand %p1980_p13, %p1974_p8 }
 0x5a9   : > { %1984 = shalt.err (!%p1981_p0)
}
 0x5aa   : > { %s2024_s7 = smov 128   ;;  %s2025_s8 = smov 8  }
 0x5ab   : > { %1810 = dma.vmem_to_hbm [thread:$0]  (%p2089_p5), %s2291_s10, 256, %s2289_s13, %s2297_s19, %s2024_s7, %s2024_s7, %s2025_s8  }
 0x5ac PF: > { %p1816_p1 = scmp.ge.s32.totalorder %s2019_s18, 2  ;;  %s1572_s9 = sand.u32 1, %s2007_s15  }
 0x5ad   : > { %s1573_s11 = scalar_lea.sflag [#allocation3], %s1572_s9 }
 0x5ae   : > { %p1813_p2 = pnand %p1816_p1, %p2093_p6 }
 0x5b0   : > { %2002 = dma.done.wait (!%p1813_p2), %s1573_s11, 256  }
 0x5b1   : > { %2004 = vsyncadd (!%p1813_p2), %s1573_s11, 4294967040  ;;  %p14_p3 = scmp.ge.s32.totalorder %s2076_s21, 4   ;;  %s2345_s15 = smov %s2011_s16 }
 0x5b2   : > { %s2346_s16 = smov %s2015_s17  ;;  %s2347_s17 = smov %s2087_s24 }
 0x5b3   : > { %s2348_s18 = smov %s2076_s21  ;;  %16 = sbr.rel (!%p14_p3) target bundleno = 3 (0x3), region = 71 }
 0x5ba   :  { %1578 = vsyncpa [#allocation3], 1 }
 0x5bb   :  { %1580 = vsyncpa [#allocation3 + $0x1], 1 }

</bundles_post_ra>
